<compile_context>
chip_gen: v6e
topology: v6e:2x2x1
jax: 0.10.0
libtpu: 0.0.40
codegen_flags: <defaults>
</compile_context>

<pallas_src>
import functools

import jax
import jax.numpy as jnp
from jax.experimental import pallas as pl
from jax.experimental.pallas import tpu as pltpu


LEAKY_SLOPE = 0.01   # torch.nn.LeakyReLU default
BN_EPS = 1e-5        # torch.nn.BatchNorm2d default


def _attention_gate_kernel(x_ref, g_ref, w_ref, wpsi_ref, b_ref, out_ref, *, ch, cg):
    """Fused AttentionGate for one (batch-subblock, pixel-tile) block.

    x_ref   : (Bt, Ch, T)   high-res features
    g_ref   : (Bt, Cg, T)   gating features
    w_ref   : (Ch, Ch+Cg+Ch) packed [Wx | Wg | Wf_eff]
    wpsi_ref: (1, Ch)
    b_ref   : (Ch, 3)       col0 = bx+bg, col1 = bf_eff (folded BN), col2[0] = bpsi
    out_ref : (Bt, Ch, T)
    """
    # Loop-invariant weight unpack (hoisted above the batch loop).
    w = w_ref[...].astype(jnp.float32)
    w_xg = w[:, : ch + cg]                       # (Ch, Ch+Cg)
    w_f = w[:, ch + cg:]                         # (Ch, Ch)   BN-folded final conv
    wpsi = wpsi_ref[...].astype(jnp.float32)     # (1, Ch)
    b = b_ref[...].astype(jnp.float32)
    b_xg = b[:, 0:1]                             # (Ch, 1)    bx + bg
    b_f = b[:, 1:2]                              # (Ch, 1)    folded BN bias
    b_psi = b[0:1, 2:3]                          # (1, 1)

    bt = x_ref.shape[0]
    for i in range(bt):                          # static unroll over batch sub-block
        x = x_ref[i].astype(jnp.float32)         # (Ch, T)
        g = g_ref[i].astype(jnp.float32)         # (Cg, T)

        # Final conv does not depend on the attention branch; since att is a
        # per-pixel scalar broadcast over channels:
        #   Wf @ (x * att) + bf == (Wf @ x) * att + bf
        # so issue this matmul immediately (overlaps with the attention branch).
        y = jnp.dot(w_f, x, preferred_element_type=jnp.float32)      # (Ch, T)

        # Fused xw + gw: single dot with K = Ch + Cg.
        xg = jnp.concatenate([x, g], axis=0)                         # (Ch+Cg, T)
        a = jnp.dot(w_xg, xg, preferred_element_type=jnp.float32) + b_xg
        a = jnp.where(a >= 0.0, a, LEAKY_SLOPE * a)                  # LeakyReLU

        s = jnp.dot(wpsi, a, preferred_element_type=jnp.float32) + b_psi  # (1, T)
        att = jax.nn.sigmoid(s)                                      # EUP

        out_ref[i] = (y * att + b_f).astype(out_ref.dtype)


def attention_gate(x, g, params, *, tile_p=4096, target_block_pixels=4096,
                   max_batch_block=8):
    """x: (B, Ch, H, W) high-res, g: (B, Cg, H, W) gating. Returns (B, Ch, H, W)."""
    B, Ch, H, W = x.shape
    Bg, Cg, Hg, Wg = g.shape
    assert B == Bg
    # TODO(synk): bilinear upsampling path when spatial sizes differ is not implemented.
    assert (H, W) == (Hg, Wg), "kernel requires matching spatial sizes"

    # Fold inference-mode BatchNorm into the (bias-free) final 1x1 conv.
    bn_scale = params["bn_gamma"] / jnp.sqrt(params["bn_var"] + BN_EPS)
    wf_eff = params["wf"] * bn_scale[:, None]
    bf_eff = params["bn_beta"] - params["bn_mean"] * bn_scale

    # Operand packing: one weight slab, one bias slab, plus wpsi.
    w_slab = jnp.concatenate(
        [params["wx"], params["wg"], wf_eff], axis=1
    ).astype(jnp.float32)                                           # (Ch, Ch+Cg+Ch)
    b_xg = params["bx"] + params["bg"]                              # bx + bg folded
    bpsi_col = jnp.full((Ch,), params["bpsi"][0], jnp.float32)      # bpsi in col 2, row 0
    b_slab = jnp.stack(
        [b_xg.astype(jnp.float32), bf_eff.astype(jnp.float32), bpsi_col], axis=1
    )                                                               # (Ch, 3)
    wpsi = params["wpsi"].astype(jnp.float32)                       # (1, Ch)

    # Tiling: lane-dense pixel tiles (multiple of 128, or the full spatial dim),
    # with no wrapper-side padding (pl.cdiv grid + masked boundary stores).
    P = H * W
    if P <= tile_p:
        tile = P                              # full dim: always a legal block
    else:
        assert tile_p % 128 == 0, "tile_p must be a multiple of 128"
        tile = tile_p

    # For small images, pack several batch elements per grid step so per-step
    # overhead / DMA setup is amortized.
    bt = max(1, min(B, max_batch_block, -(-target_block_pixels // tile)))

    x2 = x.reshape(B, Ch, P)                  # free reshape (contiguous)
    g2 = g.reshape(B, Cg, P)

    grid = (pl.cdiv(B, bt), pl.cdiv(P, tile))
    kernel = functools.partial(_attention_gate_kernel, ch=Ch, cg=Cg)

    out = pl.pallas_call(
        kernel,
        out_shape=jax.ShapeDtypeStruct((B, Ch, P), x.dtype),
        grid=grid,
        in_specs=[
            pl.BlockSpec((bt, Ch, tile), lambda b, j: (b, 0, j)),
            pl.BlockSpec((bt, Cg, tile), lambda b, j: (b, 0, j)),
            pl.BlockSpec((Ch, 2 * Ch + Cg), lambda b, j: (0, 0)),
            pl.BlockSpec((1, Ch), lambda b, j: (0, 0)),
            pl.BlockSpec((Ch, 3), lambda b, j: (0, 0)),
        ],
        out_specs=pl.BlockSpec((bt, Ch, tile), lambda b, j: (b, 0, j)),
        compiler_params=pltpu.CompilerParams(
            dimension_semantics=("parallel", "parallel"),
            # NOTE: set vmem_limit_bytes here if tile_p is pushed >= 8192 on v5e.
        ),
    )(x2, g2, w_slab, wpsi, b_slab)

    return out.reshape(B, Ch, H, W)


def _reference(x, g, params):
    """Pure-JAX mirror of the PyTorch forward (inference BatchNorm), f32."""
    x = x.astype(jnp.float32)
    g = g.astype(jnp.float32)
    wx, bx = params["wx"], params["bx"]
    wg_, bg_ = params["wg"], params["bg"]
    wpsi, bpsi = params["wpsi"], params["bpsi"]
    wf = params["wf"]
    gamma, beta = params["bn_gamma"], params["bn_beta"]
    rmean, rvar = params["bn_mean"], params["bn_var"]

    xw = jnp.einsum("oc,bchw->bohw", wx, x) + bx[None, :, None, None]
    gw = jnp.einsum("oc,bchw->bohw", wg_, g) + bg_[None, :, None, None]
    a = xw + gw
    a = jnp.where(a >= 0.0, a, LEAKY_SLOPE * a)
    s = jnp.einsum("oc,bchw->bohw", wpsi, a) + bpsi[None, :, None, None]
    h = jax.nn.sigmoid(s)
    z = x * h
    zz = jnp.einsum("oc,bchw->bohw", wf, z)
    out = (gamma[None, :, None, None]
           * (zz - rmean[None, :, None, None])
           / jnp.sqrt(rvar[None, :, None, None] + BN_EPS)
           + beta[None, :, None, None])
    return out


if __name__ == "__main__":
    key = jax.random.PRNGKey(0)
    ks = jax.random.split(key, 13)

    B, Ch, Cg, H, W = 2, 32, 16, 16, 16   # high_channels=32, low_channels=16

    x = jax.random.normal(ks[0], (B, Ch, H, W), jnp.float32)
    g = jax.random.normal(ks[1], (B, Cg, H, W), jnp.float32)

    params = dict(
        wx=0.1 * jax.random.normal(ks[2], (Ch, Ch), jnp.float32),
        bx=0.1 * jax.random.normal(ks[3], (Ch,), jnp.float32),
        wg=0.1 * jax.random.normal(ks[4], (Ch, Cg), jnp.float32),
        bg=0.1 * jax.random.normal(ks[5], (Ch,), jnp.float32),
        wpsi=0.1 * jax.random.normal(ks[6], (1, Ch), jnp.float32),
        bpsi=0.1 * jax.random.normal(ks[7], (1,), jnp.float32),
        wf=0.1 * jax.random.normal(ks[8], (Ch, Ch), jnp.float32),
        bn_gamma=1.0 + 0.1 * jax.random.normal(ks[9], (Ch,), jnp.float32),
        bn_beta=0.1 * jax.random.normal(ks[10], (Ch,), jnp.float32),
        bn_mean=0.1 * jax.random.normal(ks[11], (Ch,), jnp.float32),
        bn_var=1.0 + 0.5 * jax.random.uniform(ks[12], (Ch,), jnp.float32),
    )

    # f32 streaming path.
    out = jax.block_until_ready(attention_gate(x, g, params))
    ref = _reference(x, g, params)
    assert out.shape == (B, Ch, H, W)
    err = float(jnp.max(jnp.abs(out - ref)))
    assert jnp.allclose(out, ref, rtol=1e-3, atol=1e-3), f"f32 max err {err}"

    # bf16 streaming path (half the HBM bytes; in-kernel math stays f32).
    x_bf = x.astype(jnp.bfloat16)
    g_bf = g.astype(jnp.bfloat16)
    out_bf = jax.block_until_ready(attention_gate(x_bf, g_bf, params))
    ref_bf = _reference(x_bf, g_bf, params)
    err_bf = float(jnp.max(jnp.abs(out_bf.astype(jnp.float32) - ref_bf)))
    assert out_bf.dtype == jnp.bfloat16
    assert jnp.allclose(out_bf.astype(jnp.float32), ref_bf, rtol=3e-2, atol=3e-2), \
        f"bf16 max err {err_bf}"

    print("KERNEL_OK")
</pallas_src>

<mosaic_0001>
module attributes {stable_mosaic.version = 11 : i64} {
  func.func @_attention_gate_kernel(%arg0: i32, %arg1: i32, %arg2: memref<2x32x256xf32, #tpu.memory_space<vmem>>, %arg3: memref<2x16x256xf32, #tpu.memory_space<vmem>>, %arg4: memref<32x80xf32, #tpu.memory_space<vmem>>, %arg5: memref<1x32xf32, #tpu.memory_space<vmem>>, %arg6: memref<32x3xf32, #tpu.memory_space<vmem>>, %arg7: memref<2x32x256xf32, #tpu.memory_space<vmem>>) attributes {dimension_semantics = [#tpu.dimension_semantics<parallel>, #tpu.dimension_semantics<parallel>], iteration_bounds = array<i64: 1, 1>, scalar_prefetch = 0 : i64, scratch_operands = 0 : i64, tpu.core_type = #tpu.core_type<tc>, window_params = [{transform_indices = @transform_0, window_bounds = array<i64: 2, 32, 256>}, {transform_indices = @transform_1, window_bounds = array<i64: 2, 16, 256>}, {pipeline_mode = #tpu.pipeline_mode<synchronous>, transform_indices = @transform_2, window_bounds = array<i64: 32, 80>}, {pipeline_mode = #tpu.pipeline_mode<synchronous>, transform_indices = @transform_3, window_bounds = array<i64: 1, 32>}, {pipeline_mode = #tpu.pipeline_mode<synchronous>, transform_indices = @transform_4, window_bounds = array<i64: 32, 3>}, {transform_indices = @transform_5, window_bounds = array<i64: 2, 32, 256>}]} {
    %c0 = arith.constant 0 : index
    %c0_0 = arith.constant 0 : index
    %0 = vector.load %arg4[%c0, %c0_0] : memref<32x80xf32, #tpu.memory_space<vmem>>, vector<32x80xf32>
    %1 = vector.extract_strided_slice %0 {offsets = [0, 0], sizes = [32, 48], strides = [1, 1]} : vector<32x80xf32> to vector<32x48xf32>
    %2 = vector.extract_strided_slice %0 {offsets = [0, 48], sizes = [32, 32], strides = [1, 1]} : vector<32x80xf32> to vector<32x32xf32>
    %c0_1 = arith.constant 0 : index
    %c0_2 = arith.constant 0 : index
    %3 = vector.load %arg5[%c0_1, %c0_2] : memref<1x32xf32, #tpu.memory_space<vmem>>, vector<1x32xf32>
    %c0_3 = arith.constant 0 : index
    %c0_4 = arith.constant 0 : index
    %4 = vector.load %arg6[%c0_3, %c0_4] : memref<32x3xf32, #tpu.memory_space<vmem>>, vector<32x3xf32>
    %5 = vector.extract_strided_slice %4 {offsets = [0, 0], sizes = [32, 1], strides = [1, 1]} : vector<32x3xf32> to vector<32x1xf32>
    %6 = vector.extract_strided_slice %4 {offsets = [0, 1], sizes = [32, 1], strides = [1, 1]} : vector<32x3xf32> to vector<32x1xf32>
    %7 = vector.extract_strided_slice %4 {offsets = [0, 2], sizes = [1, 1], strides = [1, 1]} : vector<32x3xf32> to vector<1x1xf32>
    %c0_5 = arith.constant 0 : index
    %c0_6 = arith.constant 0 : index
    %c0_7 = arith.constant 0 : index
    %8 = vector.load %arg2[%c0_5, %c0_6, %c0_7] : memref<2x32x256xf32, #tpu.memory_space<vmem>>, vector<1x32x256xf32>
    %9 = vector.shape_cast %8 : vector<1x32x256xf32> to vector<32x256xf32>
    %c0_8 = arith.constant 0 : index
    %c0_9 = arith.constant 0 : index
    %c0_10 = arith.constant 0 : index
    %10 = vector.load %arg3[%c0_8, %c0_9, %c0_10] : memref<2x16x256xf32, #tpu.memory_space<vmem>>, vector<1x16x256xf32>
    %11 = vector.shape_cast %10 : vector<1x16x256xf32> to vector<16x256xf32>
    %cst = arith.constant dense<0.000000e+00> : vector<32x256xf32>
    %12 = tpu.matmul %2, %9, %cst {dimension_numbers = #tpu.dot_dimension_numbers<[1], [0], [0], [1], [0, 0, 1, 1], [], []>} : vector<32x32xf32>, vector<32x256xf32>, vector<32x256xf32> -> vector<32x256xf32>
    %13 = tpu.concatenate %9, %11 in 0 : vector<32x256xf32>, vector<16x256xf32> -> vector<48x256xf32>
    %cst_11 = arith.constant dense<0.000000e+00> : vector<32x256xf32>
    %14 = tpu.matmul %1, %13, %cst_11 {dimension_numbers = #tpu.dot_dimension_numbers<[1], [0], [0], [1], [0, 0, 1, 1], [], []>} : vector<32x48xf32>, vector<48x256xf32>, vector<32x256xf32> -> vector<32x256xf32>
    %15 = vector.broadcast %5 : vector<32x1xf32> to vector<32x256xf32>
    %16 = arith.addf %14, %15 : vector<32x256xf32>
    %cst_12 = arith.constant 0.000000e+00 : f32
    %17 = vector.broadcast %cst_12 : f32 to vector<32x256xf32>
    %18 = arith.cmpf oge, %16, %17 : vector<32x256xf32>
    %cst_13 = arith.constant 0.00999999977 : f32
    %19 = vector.broadcast %cst_13 : f32 to vector<32x256xf32>
    %20 = arith.mulf %19, %16 : vector<32x256xf32>
    %21 = arith.select %18, %16, %20 : vector<32x256xi1>, vector<32x256xf32>
    %cst_14 = arith.constant dense<0.000000e+00> : vector<1x256xf32>
    %22 = tpu.matmul %3, %21, %cst_14 {dimension_numbers = #tpu.dot_dimension_numbers<[1], [0], [0], [1], [0, 0, 1, 1], [], []>} : vector<1x32xf32>, vector<32x256xf32>, vector<1x256xf32> -> vector<1x256xf32>
    %23 = vector.broadcast %7 : vector<1x1xf32> to vector<1x256xf32>
    %24 = arith.addf %22, %23 : vector<1x256xf32>
    %25 = arith.negf %24 : vector<1x256xf32>
    %26 = math.exp %25 : vector<1x256xf32>
    %cst_15 = arith.constant 1.000000e+00 : f32
    %27 = vector.broadcast %cst_15 : f32 to vector<1x256xf32>
    %28 = arith.addf %27, %26 : vector<1x256xf32>
    %29 = arith.divf %27, %28 : vector<1x256xf32>
    %30 = vector.broadcast %29 : vector<1x256xf32> to vector<32x256xf32>
    %31 = arith.mulf %12, %30 : vector<32x256xf32>
    %32 = vector.broadcast %6 : vector<32x1xf32> to vector<32x256xf32>
    %33 = arith.addf %31, %32 : vector<32x256xf32>
    %c0_16 = arith.constant 0 : index
    %c0_17 = arith.constant 0 : index
    %c0_18 = arith.constant 0 : index
    %34 = vector.load %arg7[%c0_16, %c0_17, %c0_18] : memref<2x32x256xf32, #tpu.memory_space<vmem>>, vector<1x32x256xf32>
    %35 = vector.shape_cast %34 : vector<1x32x256xf32> to vector<32x256xf32>
    %36 = vector.shape_cast %33 : vector<32x256xf32> to vector<1x32x256xf32>
    tpu.vector_store %arg7[%c0_16, %c0_17, %c0_18], %36 {strides = array<i32>} : memref<2x32x256xf32, #tpu.memory_space<vmem>>, vector<1x32x256xf32>,
    %c1 = arith.constant 1 : index
    %c0_19 = arith.constant 0 : index
    %c0_20 = arith.constant 0 : index
    %37 = vector.load %arg2[%c1, %c0_19, %c0_20] : memref<2x32x256xf32, #tpu.memory_space<vmem>>, vector<1x32x256xf32>
    %38 = vector.shape_cast %37 : vector<1x32x256xf32> to vector<32x256xf32>
    %c1_21 = arith.constant 1 : index
    %c0_22 = arith.constant 0 : index
    %c0_23 = arith.constant 0 : index
    %39 = vector.load %arg3[%c1_21, %c0_22, %c0_23] : memref<2x16x256xf32, #tpu.memory_space<vmem>>, vector<1x16x256xf32>
    %40 = vector.shape_cast %39 : vector<1x16x256xf32> to vector<16x256xf32>
    %cst_24 = arith.constant dense<0.000000e+00> : vector<32x256xf32>
    %41 = tpu.matmul %2, %38, %cst_24 {dimension_numbers = #tpu.dot_dimension_numbers<[1], [0], [0], [1], [0, 0, 1, 1], [], []>} : vector<32x32xf32>, vector<32x256xf32>, vector<32x256xf32> -> vector<32x256xf32>
    %42 = tpu.concatenate %38, %40 in 0 : vector<32x256xf32>, vector<16x256xf32> -> vector<48x256xf32>
    %cst_25 = arith.constant dense<0.000000e+00> : vector<32x256xf32>
    %43 = tpu.matmul %1, %42, %cst_25 {dimension_numbers = #tpu.dot_dimension_numbers<[1], [0], [0], [1], [0, 0, 1, 1], [], []>} : vector<32x48xf32>, vector<48x256xf32>, vector<32x256xf32> -> vector<32x256xf32>
    %44 = vector.broadcast %5 : vector<32x1xf32> to vector<32x256xf32>
    %45 = arith.addf %43, %44 : vector<32x256xf32>
    %cst_26 = arith.constant 0.000000e+00 : f32
    %46 = vector.broadcast %cst_26 : f32 to vector<32x256xf32>
    %47 = arith.cmpf oge, %45, %46 : vector<32x256xf32>
    %cst_27 = arith.constant 0.00999999977 : f32
    %48 = vector.broadcast %cst_27 : f32 to vector<32x256xf32>
    %49 = arith.mulf %48, %45 : vector<32x256xf32>
    %50 = arith.select %47, %45, %49 : vector<32x256xi1>, vector<32x256xf32>
    %cst_28 = arith.constant dense<0.000000e+00> : vector<1x256xf32>
    %51 = tpu.matmul %3, %50, %cst_28 {dimension_numbers = #tpu.dot_dimension_numbers<[1], [0], [0], [1], [0, 0, 1, 1], [], []>} : vector<1x32xf32>, vector<32x256xf32>, vector<1x256xf32> -> vector<1x256xf32>
    %52 = vector.broadcast %7 : vector<1x1xf32> to vector<1x256xf32>
    %53 = arith.addf %51, %52 : vector<1x256xf32>
    %54 = arith.negf %53 : vector<1x256xf32>
    %55 = math.exp %54 : vector<1x256xf32>
    %cst_29 = arith.constant 1.000000e+00 : f32
    %56 = vector.broadcast %cst_29 : f32 to vector<1x256xf32>
    %57 = arith.addf %56, %55 : vector<1x256xf32>
    %58 = arith.divf %56, %57 : vector<1x256xf32>
    %59 = vector.broadcast %58 : vector<1x256xf32> to vector<32x256xf32>
    %60 = arith.mulf %41, %59 : vector<32x256xf32>
    %61 = vector.broadcast %6 : vector<32x1xf32> to vector<32x256xf32>
    %62 = arith.addf %60, %61 : vector<32x256xf32>
    %c1_30 = arith.constant 1 : index
    %c0_31 = arith.constant 0 : index
    %c0_32 = arith.constant 0 : index
    %63 = vector.load %arg7[%c1_30, %c0_31, %c0_32] : memref<2x32x256xf32, #tpu.memory_space<vmem>>, vector<1x32x256xf32>
    %64 = vector.shape_cast %63 : vector<1x32x256xf32> to vector<32x256xf32>
    %65 = vector.shape_cast %62 : vector<32x256xf32> to vector<1x32x256xf32>
    tpu.vector_store %arg7[%c1_30, %c0_31, %c0_32], %65 {strides = array<i32>} : memref<2x32x256xf32, #tpu.memory_space<vmem>>, vector<1x32x256xf32>,
    return
  }
  func.func @transform_0(%arg0: i32, %arg1: i32) -> (i32, i32, i32) {
    %c0_i32 = arith.constant 0 : i32
    %c0_i32_0 = arith.constant 0 : i32
    return %arg0, %c0_i32, %arg1 : i32, i32, i32
  }
  func.func @transform_1(%arg0: i32, %arg1: i32) -> (i32, i32, i32) {
    %c0_i32 = arith.constant 0 : i32
    %c0_i32_0 = arith.constant 0 : i32
    return %arg0, %c0_i32, %arg1 : i32, i32, i32
  }
  func.func @transform_2(%arg0: i32, %arg1: i32) -> (i32, i32) {
    %c0_i32 = arith.constant 0 : i32
    %c0_i32_0 = arith.constant 0 : i32
    %c0_i32_1 = arith.constant 0 : i32
    return %c0_i32, %c0_i32_0 : i32, i32
  }
  func.func @transform_3(%arg0: i32, %arg1: i32) -> (i32, i32) {
    %c0_i32 = arith.constant 0 : i32
    %c0_i32_0 = arith.constant 0 : i32
    %c0_i32_1 = arith.constant 0 : i32
    return %c0_i32, %c0_i32_0 : i32, i32
  }
  func.func @transform_4(%arg0: i32, %arg1: i32) -> (i32, i32) {
    %c0_i32 = arith.constant 0 : i32
    %c0_i32_0 = arith.constant 0 : i32
    %c0_i32_1 = arith.constant 0 : i32
    return %c0_i32, %c0_i32_0 : i32, i32
  }
  func.func @transform_5(%arg0: i32, %arg1: i32) -> (i32, i32, i32) {
    %c0_i32 = arith.constant 0 : i32
    %c0_i32_0 = arith.constant 0 : i32
    return %arg0, %c0_i32, %arg1 : i32, i32, i32
  }
}

</mosaic_0001>

<bundles_post_ra>
// kernel: tpu_custom_call.1
= control target key start
LH: loop header
LB: loop body
LE: loop exit
PB: predicated region body
PF: predicated region fallthrough
CT: control target
= control target key end

     0   :  { %10 = vsyncpa [#allocation3], 0  ;;  %s1208_s0 = inlined_call_operand.hbm [shape: f32[2,32,256], index: 0, kind: input, shape index: {}]   ;;  %s1209_s1 = inlined_call_operand.hbm [shape: f32[2,16,256], index: 1, kind: input, shape index: {}]   ;;  %s1210_s2 = inlined_call_operand.vmem [shape: f32[32,80], index: 2, kind: input, shape index: {}]   ;;  %s1211_s3 = inlined_call_operand.vmem [shape: f32[1,32], index: 3, kind: input, shape index: {}]   ;;  %s1212_s4 = inlined_call_operand.vmem [shape: f32[32,3], index: 4, kind: input, shape index: {}]   ;;  %s1213_s5 = inlined_call_operand.hbm [shape: f32[2,32,256], index: 5, kind: output, shape index: {}]  }
   0x1   :  { %11 = vsyncpa [#allocation6], 0 }
   0x2   :  { %12 = vsyncpa [#allocation4], 0  ;;  %s929_s18 = smov [#allocation2]  }
   0x3   :  { %s18_s19 = sshll.u32 %s929_s18, 4  ;;  %s19_s19 = int_to_ptr.vmem [resolvable:$true] %s18_s19 }
   0x4   :  { %s871_s20 = scalar_lea.vmem %s19_s19, 2048  ;;  %p876_p1 = scmp.lt.s32.totalorder %s19_s19, %s19_s19 }
   0x5   :  { %p872_p0 = scmp.ne.s32.totalorder %s19_s19, %s871_s20  ;;  %p877_p2 = scmp.lt.s32.totalorder %s871_s20, %s871_s20 }
   0x7   :  { %p878_p3 = por %p877_p2, %p876_p1 }
   0x9   :  { %p879_p4 = pnand %p878_p3, %p872_p0 }
   0xb   :  { %882 = shalt.err (!%p879_p4)
}
   0xc   :  { %s930_s21 = smov 256   ;;  %s931_s22 = smov 16  }
   0xd   :  { %24 = dma.hbm_to_vmem [thread:$0]  %s1208_s0, 2048, %s19_s19, [#allocation3], %s930_s21, %s930_s21, %s931_s22  }
   0xe   :  { %s932_s25 = smov [#allocation5]  }
   0xf   :  { %s30_s26 = sshll.u32 %s932_s25, 4  ;;  %s31_s26 = int_to_ptr.vmem [resolvable:$true] %s30_s26 }
  0x10   :  { %s891_s27 = scalar_lea.vmem %s31_s26, 1024  ;;  %p896_p6 = scmp.lt.s32.totalorder %s31_s26, %s31_s26 }
  0x11   :  { %p892_p5 = scmp.ne.s32.totalorder %s31_s26, %s891_s27  ;;  %p897_p7 = scmp.lt.s32.totalorder %s891_s27, %s891_s27 }
  0x13   :  { %p898_p8 = por %p897_p7, %p896_p6 }
  0x15   :  { %p899_p9 = pnand %p898_p8, %p892_p5 }
  0x17   :  { %902 = shalt.err (!%p899_p9)
}
  0x18   :  { %36 = dma.hbm_to_vmem [thread:$0]  %s1209_s1, 1024, %s31_s26, [#allocation6], %s930_s21, %s930_s21, %s931_s22  }
  0x19   :  { %923 = dma.done.wait [#allocation3], 2048  }
  0x1a   :  { %924 = vsyncadd [#allocation3], 4294965248 }
  0x1b   :  { %925 = dma.done.wait [#allocation6], 1024  }
  0x1c   :  { %926 = vsyncadd [#allocation6], 4294966272  ;;  %v933_v0 = vmov 0.0   ;;  %v934_v1 = vmov 0   ;;  %v69_v2 = vld [vmem:[#allocation5 + $0x18] sm:$0xff]  ;;  %v68_v3 = vld [vmem:[#allocation5 + $0x10] sm:$0xff] }
  0x1d   :  { %273 = vmatprep.mubr.f32.mxu1 %v933_v0  ;;  %842 = vset.pattern.permute.xlu0 %v934_v1  ;;  %v67_v4 = vld [vmem:[#allocation5 + $0x8] sm:$0xff]  ;;  %v66_v5 = vld [vmem:[#allocation5] sm:$0xff]  ;;  %v65_v6 = vld [vmem:[#allocation2 + $0x38] sm:$0xff]  ;;  %s935_s7 = smov 80   ;;  %vm200_vm0 = vcmask 392192   ;;  %vm82_vm1 = vcmask 261120  }
  0x1e   :  { %843 = vset.pattern.permute.xlu1 %v934_v1  ;;  %155 = vmatprep.mubr.f32.mxu0 %v933_v0  ;;  %v64_v7 = vld [vmem:[#allocation2 + $0x30] sm:$0xff]  ;;  %v63_v8 = vld [vmem:[#allocation2 + $0x28] sm:$0xff]  ;;  %v986_v9 = vld [vmem:[%s1210_s2] sm:$0xff]  ;;  %v936_v32 = vmov 2   ;;  %v937_v33 = vmov 1  }
  0x1f   :  { %229 = vmatprep.subr.mxu1 %v69_v2  ;;  %115 = vmatprep.subr.mxu0 %v65_v6  ;;  %v62_v10 = vld [vmem:[#allocation2 + $0x20] sm:$0xff]  ;;  %v991_v11 = vld [vmem:[%s1212_s4 + $0x18] sm:$0xff]  ;;  %v999_v13 = vld [vmem:[%s1212_s4 + $0x8] sm:$0xff] }
  0x20   :  { %230 = vmatpush1.msra.mxu1 %v68_v3  ;;  %116 = vmatpush1.msra.mxu0 %v64_v7  ;;  %v61_v12 = vld [vmem:[#allocation2 + $0x18] sm:$0xff]  ;;  %v60_v14 = vld [vmem:[#allocation2 + $0x10] sm:$0xff]  ;;  %v59_v16 = vld [vmem:[#allocation2 + $0x8] sm:$0xff] }
  0x21   :  { %231 = vmatprep.subr.mxu1 %v67_v4  ;;  %117 = vmatprep.subr.mxu0 %v63_v8  ;;  %v1004_v15 = vld [vmem:[%s1212_s4 + $0x10] sm:$0xff]  ;;  %v58_v17 = vld [vmem:[#allocation2] sm:$0xff]  ;;  %v1014_v19 = vld [vmem:[%s1210_s2 + $0x8] sm:$0xff] }
  0x22   :  { %232 = vmatpush1.msra.mxu1 %v66_v5  ;;  %74 = vrot.lane.b32.xlu1 %v986_v9, %s935_s7  ;;  %v54_v18 = vld [vmem:[%s1212_s4] sm:$0xff]  ;;  %v1016_v20 = vld [vmem:[#allocation2 + $0x78] sm:$0xff]  ;;  %v1022_v21 = vld [vmem:[#allocation2 + $0x70] sm:$0xff] }
  0x23   :  { %233 = vmatprep.subr.mxu1 %v65_v6  ;;  %197 = vperm.xlu0 %842, %v991_v11   ;;  %v1029_v22 = vld [vmem:[%s1210_s2 + $0x18] sm:$0xff]  ;;  %v1032_v23 = vld [vmem:[#allocation2 + $0x68] sm:$0xff]  ;;  %v1039_v24 = vld [vmem:[%s1210_s2 + $0x10] sm:$0xff] }
  0x24   :  { %234 = vmatpush1.msra.mxu1 %v64_v7  ;;  %118 = vmatpush1.msra.mxu0 %v62_v10  ;;  %v1043_v25 = vld [vmem:[#allocation2 + $0x60] sm:$0xff]  ;;  %v1048_v26 = vld [vmem:[#allocation2 + $0x58] sm:$0xff]  ;;  %v1051_v27 = vld [vmem:[#allocation2 + $0x50] sm:$0xff] }
  0x25   :  { %235 = vmatprep.subr.mxu1 %v63_v8  ;;  %119 = vmatprep.subr.mxu0 %v61_v12  ;;  %v1054_v28 = vld [vmem:[#allocation2 + $0x48] sm:$0xff]  ;;  %v1059_v29 = vld [vmem:[#allocation2 + $0x40] sm:$0xff] }
  0x26   :  { %236 = vmatpush1.msra.mxu1 %v62_v10  ;;  %187 = vperm.xlu1 %843, %v999_v13   ;;  %v1106_v8 = vld [vmem:[%s1211_s3] sm:$0x1]  ;;  %v473_v10 = vld [vmem:[#allocation5 + $0x38] sm:$0xff]  ;;  %s938_s3 = smov [#allocation7]  }
  0x27   :  { %237 = vmatprep.subr.mxu1 %v61_v12  ;;  %192 = vperm.xlu0 %842, %v1004_v15   ;;  %v472_v12 = vld [vmem:[#allocation5 + $0x30] sm:$0xff]  ;;  %s797_s20 = sshll.u32 %s938_s3, 4  ;;  %s798_s20 = int_to_ptr.vmem [resolvable:$true] %s797_s20 }
  0x28   :  { %238 = vmatpush1.msra.mxu1 %v60_v14  ;;  %120 = vmatpush1.msra.mxu0 %v60_v14  ;;  %v470_v14 = vld [vmem:[#allocation5 + $0x20] sm:$0xff]  ;;  %s903_s23 = scalar_lea.vmem %s798_s20, 2048  ;;  %p908_p11 = scmp.lt.s32.totalorder %s798_s20, %s798_s20 }
  0x29   :  { %239 = vmatprep.subr.mxu1 %v59_v16  ;;  %121 = vmatprep.subr.mxu0 %v59_v16  ;;  %p904_p10 = scmp.ne.s32.totalorder %s798_s20, %s903_s23  ;;  %p909_p12 = scmp.lt.s32.totalorder %s903_s23, %s903_s23 }
  0x2a   :  { %240 = vmatpush1.msra.mxu1 %v58_v17  ;;  %76 = vrot.lane.b32.xlu1 %v1014_v19, %s935_s7 }
  0x2b   :  { %814 = vmatmul.mubr.msk.f32.vlgmr.msra.gmra.mxu1 %vm200_vm0, %v986_v9  ;;  %182 = vperm.xlu0 %842, %v54_v18   ;;  %p910_p13 = por %p909_p12, %p908_p11 }
  0x2c   :  { %279 = vmatprep.mubr.f32.mxu1 %v933_v0  ;;  %498 = vmatprep.subr.mxu1 %v1016_v20 }
  0x2d   :  { %122 = vmatpush1.msra.mxu0 %v58_v17  ;;  %499 = vmatpush1.msra.mxu1 %v1022_v21  ;;  %p911_p0 = pnand %p910_p13, %p904_p10 }
  0x2e   :  { %80 = vrot.lane.b32.xlu1 %v1029_v22, %s935_s7  ;;  %500 = vmatprep.subr.mxu1 %v1032_v23 }
  0x2f   :  { %815 = vmatmul.mubr.msk.f32.gmra.mxu1 %vm200_vm0, %v1014_v19  ;;  %78 = vrot.lane.b32.xlu0 %v1039_v24, %s935_s7 }
  0x30   :  { %285 = vmatprep.mubr.f32.mxu1 %v933_v0  ;;  %501 = vmatpush1.msra.mxu1 %v1043_v25 }
  0x31   :  { %502 = vmatprep.subr.mxu1 %v1048_v26  ;;  %844 = vset.pattern.permute.xlu0 %v936_v32 }
  0x32   :  { %503 = vmatpush1.msra.mxu1 %v1051_v27  ;;  %845 = vset.pattern.permute.xlu1 %v937_v33 }
  0x33   :  { %816 = vmatmul.mubr.msk.f32.gmra.mxu1 %vm200_vm0, %v1039_v24  ;;  %504 = vmatprep.subr.mxu1 %v1054_v28 }
  0x34   :  { %291 = vmatprep.mubr.f32.mxu1 %v933_v0  ;;  %505 = vmatpush1.msra.mxu1 %v1059_v29 }
  0x35   :  { %323 = vperm.xlu0 %844, %v54_v18   ;;  %429 = vperm.xlu1 %845, %v54_v18  }
  0x37   :  { %817 = vmatmul.mubr.msk.f32.gmra.mxu1 %vm200_vm0, %v1029_v22 }
  0x38   :  { %538 = vmatprep.mubr.f32.mxu1 %v933_v0 }
  0x39   :  { %433 = vperm.xlu1 %845, %v999_v13   ;;  %846 = vset.pattern.permute.xlu0 %v937_v33  ;;  %v471_v13 = vld [vmem:[#allocation5 + $0x28] sm:$0xff] }
  0x3a   :  { %437 = vperm.xlu0 %846, %v1004_v15  }
  0x3d   :  { %441 = vperm.xlu1 %845, %v991_v11  }
  0x94   :  { %v75_v30 = vpop.permute.xlu1 %74 }
  0x95   :  { %810 = vmatmul.mubr.msk.f32.vlgmr.msra.gmra.mxu0 %vm82_vm1, %v75_v30  ;;  %821 = vmatmul.mubr.msk.f32.vlgmr.msra.gmra.mxu1 %vm82_vm1, %v75_v30 }
  0x96   :  { %161 = vmatprep.mubr.f32.mxu0 %v933_v0  ;;  %544 = vmatprep.mubr.f32.mxu1 %v933_v0 }
  0x9e   :  { %v1072_v31 = vpop.permute.xlu0 %197 }
  0xa1   :  { %v1074_v34 = vpop.permute.xlu1 %187 }
  0xa2   :  { %v1076_v35 = vpop.permute.xlu0 %192 }
  0xa5   :  { %v77_v36 = vpop.permute.xlu1 %76 }
  0xa6   :  { %v1080_v37 = vpop.permute.xlu0 %182  ;;  %811 = vmatmul.mubr.msk.f32.gmra.mxu0 %vm82_vm1, %v77_v36  ;;  %822 = vmatmul.mubr.msk.f32.gmra.mxu1 %vm82_vm1, %v77_v36 }
  0xa7   :  { %167 = vmatprep.mubr.f32.mxu0 %v933_v0  ;;  %550 = vmatprep.mubr.f32.mxu1 %v933_v0 }
  0xa9   :  { %v81_v39 = vpop.permute.xlu1 %80 }
  0xaa   :  { %v79_v38 = vpop.permute.xlu0 %78 }
  0xab   :  { %812 = vmatmul.mubr.msk.f32.gmra.mxu0 %vm82_vm1, %v79_v38  ;;  %823 = vmatmul.mubr.msk.f32.gmra.mxu1 %vm82_vm1, %v79_v38 }
  0xac   :  { %173 = vmatprep.mubr.f32.mxu0 %v933_v0  ;;  %556 = vmatprep.mubr.f32.mxu1 %v933_v0 }
  0xaf   :  { %813 = vmatmul.mubr.msk.f32.gmra.mxu0 %vm82_vm1, %v81_v39  ;;  %824 = vmatmul.mubr.msk.f32.gmra.mxu1 %vm82_vm1, %v81_v39 }
  0xb0   :  { %393 = vmatprep.mubr.f32.mxu0 %v933_v0  ;;  %740 = vmatprep.mubr.f32.mxu1 %v933_v0 }
  0xeb   :  { %v275_v40 = vpop.f32.mrf.mxu1 }
  0xec   :  { %v276_v58 = vadd.f32 %v275_v40, %v1080_v37 }
  0xed   :  { %v277_v41 = vpop.f32.mrf.mxu1 }
  0xee   :  { %v278_v53 = vadd.f32 %v277_v41, %v1080_v37  ;;  %v306_v3 = vmul.f32 0.01, %v276_v58  ;;  %vm298_vm9 = vcmp.ge.f32.partialorder %v276_v58, 0.0 }
  0xef   :  { %v281_v42 = vpop.f32.mrf.mxu1 }
  0xf0   :  { %v282_v54 = vadd.f32 %v281_v42, %v1074_v34  ;;  %v307_v1 = vmul.f32 0.01, %v278_v53  ;;  %vm299_vm8 = vcmp.ge.f32.partialorder %v278_v53, 0.0  ;;  %v314_v11 = vsel %vm298_vm9, %v276_v58, %v306_v3 }
  0xf1   :  { %v283_v43 = vpop.f32.mrf.mxu1  ;;  %v412_v42 = vlaneseq }
  0xf2   :  { %v284_v51 = vadd.f32 %v283_v43, %v1074_v34  ;;  %v308_v62 = vmul.f32 0.01, %v282_v54  ;;  %vm300_vm7 = vcmp.ge.f32.partialorder %v282_v54, 0.0  ;;  %v315_v7 = vsel %vm299_vm8, %v278_v53, %v307_v1 }
  0xf3   :  { %v287_v44 = vpop.f32.mrf.mxu1 }
  0xf4   :  { %v288_v49 = vadd.f32 %v287_v44, %v1076_v35  ;;  %v309_v60 = vmul.f32 0.01, %v284_v51  ;;  %vm301_vm6 = vcmp.ge.f32.partialorder %v284_v51, 0.0  ;;  %v316_v6 = vsel %vm300_vm7, %v282_v54, %v308_v62 }
  0xf5   :  { %v289_v45 = vpop.f32.mrf.mxu1 }
  0xf6   :  { %v290_v47 = vadd.f32 %v289_v45, %v1076_v35  ;;  %v310_v59 = vmul.f32 0.01, %v288_v49  ;;  %vm302_vm5 = vcmp.ge.f32.partialorder %v288_v49, 0.0  ;;  %v317_v5 = vsel %vm301_vm6, %v284_v51, %v309_v60 }
  0xf7   :  { %v293_v46 = vpop.f32.mrf.mxu1  ;;  %v413_v51 = vshrl.u32 %v412_v42, 7 }
  0xf8   :  { %v294_v48 = vadd.f32 %v293_v46, %v1072_v31  ;;  %v311_v56 = vmul.f32 0.01, %v290_v47  ;;  %vm303_vm4 = vcmp.ge.f32.partialorder %v290_v47, 0.0  ;;  %v318_v4 = vsel %vm302_vm5, %v288_v49, %v310_v59  ;;  %v1152_v46 = vpop.permute.xlu1 %429 }
  0xf9   :  { %v295_v50 = vpop.f32.mrf.mxu1  ;;  %v1160_v59 = vsub.s32 0, %v413_v51 }
  0xfa   :  { %v296_v52 = vadd.f32 %v295_v50, %v1072_v31  ;;  %v312_v55 = vmul.f32 0.01, %v294_v48  ;;  %vm304_vm2 = vcmp.ge.f32.partialorder %v294_v48, 0.0  ;;  %v319_v2 = vsel %vm303_vm4, %v290_v47, %v311_v56 }
  0xfc   :  { %v313_v57 = vmul.f32 0.01, %v296_v52  ;;  %vm305_vm3 = vcmp.ge.f32.partialorder %v296_v52, 0.0  ;;  %v320_v63 = vsel %vm304_vm2, %v294_v48, %v312_v55 }
  0xfe   :  { %v321_v61 = vsel %vm305_vm3, %v296_v52, %v313_v57 }
  0xff   :  { %353 = vmatprep.subr.mxu0 %v321_v61 }
 0x100   :  { %354 = vmatpush1.msra.mxu0 %v320_v63 }
 0x101   :  { %355 = vmatprep.subr.mxu0 %v319_v2 }
 0x102   :  { %356 = vmatpush1.msra.mxu0 %v318_v4 }
 0x103   :  { %357 = vmatprep.subr.mxu0 %v317_v5 }
 0x104   :  { %358 = vmatpush1.msra.mxu0 %v316_v6 }
 0x105   :  { %359 = vmatprep.subr.mxu0 %v315_v7 }
 0x106   :  { %360 = vmatpush1.msra.mxu0 %v314_v11 }
 0x107   :  { %818 = vmatmul.mubr.msk.f32.vlgmr.msra.gmra.mxu0 %vm82_vm1, %v1106_v8  ;;  %583 = vmatprep.subr.mxu0 %v473_v10 }
 0x108   :  { %584 = vmatpush1.msra.mxu0 %v472_v12  ;;  %627 = vmatprep.mubr.f32.mxu0 %v933_v0 }
 0x109   :  { %585 = vmatprep.subr.mxu0 %v471_v13 }
 0x10a   :  { %586 = vmatpush1.msra.mxu0 %v470_v14 }
 0x10b   :  { %587 = vmatprep.subr.mxu0 %v1016_v20 }
 0x10c   :  { %588 = vmatpush1.msra.mxu0 %v1022_v21 }
 0x10d   :  { %589 = vmatprep.subr.mxu0 %v1032_v23 }
 0x10e   :  { %590 = vmatpush1.msra.mxu0 %v1043_v25 }
 0x10f   :  { %591 = vmatprep.subr.mxu0 %v1048_v26 }
 0x110   :  { %592 = vmatpush1.msra.mxu0 %v1051_v27 }
 0x111   :  { %593 = vmatprep.subr.mxu0 %v1054_v28 }
 0x112   :  { %594 = vmatpush1.msra.mxu0 %v1059_v29 }
 0x113   :  { %825 = vmatmul.mubr.msk.f32.vlgmr.msra.gmra.mxu0 %vm200_vm0, %v986_v9 }
 0x114   :  { %633 = vmatprep.mubr.f32.mxu0 %v933_v0 }
 0x117   :  { %826 = vmatmul.mubr.msk.f32.gmra.mxu0 %vm200_vm0, %v1014_v19 }
 0x118   :  { %639 = vmatprep.mubr.f32.mxu0 %v933_v0 }
 0x11b   :  { %827 = vmatmul.mubr.msk.f32.gmra.mxu0 %vm200_vm0, %v1039_v24 }
 0x11c   :  { %645 = vmatprep.mubr.f32.mxu0 %v933_v0  ;;  %v1146_v0 = vpop.permute.xlu0 %323 }
 0x11f   :  { %828 = vmatmul.mubr.msk.f32.gmra.mxu0 %vm200_vm0, %v1029_v22 }
 0x120   :  { %v1169_v13 = vpop.permute.xlu0 %437 }
 0x155   :  { %v1130_v15 = vpop.f32.mrf.mxu0 }
 0x157   :  { %v1132_v16 = vpop.f32.mrf.mxu0 }
 0x166   :  { %v1134_v9 = vpop.f32.mrf.mxu0 }
 0x168   :  { %v1136_v17 = vpop.f32.mrf.mxu0 }
 0x16b   :  { %v1138_v18 = vpop.f32.mrf.mxu0 }
 0x16d   :  { %v1140_v19 = vpop.f32.mrf.mxu0 }
 0x16f   :  { %v1142_v20 = vpop.f32.mrf.mxu0 }
 0x171   :  { %v1144_v21 = vpop.f32.mrf.mxu0 }
 0x1c7   :  { %v395_v23 = vpop.f32.mrf.mxu0 }
 0x1c8   :  { %v396_v22 = vadd.f32 %v395_v23, %v1146_v0 }
 0x1c9   :  { %v397_v24 = vpop.f32.mrf.mxu0 }
 0x1ca   :  { %v819_v25 = vmul.f32 -1.442695, %v396_v22  ;;  %v398_v26 = vadd.f32 %v397_v24, %v1146_v0 }
 0x1cc   :  { %847 = vpow2.f32 %v819_v25  ;;  %v820_v27 = vmul.f32 -1.442695, %v398_v26 }
 0x1ce   :  { %849 = vpow2.f32 %v820_v27 }
 0x1d3   :  { %v629_v28 = vpop.f32.mrf.mxu0 }
 0x1d4   :  { %v630_v57 = vadd.f32 %v629_v28, %v1080_v37 }
 0x1d5   :  { %v631_v29 = vpop.f32.mrf.mxu0 }
 0x1d6   :  { %v632_v52 = vadd.f32 %v631_v29, %v1080_v37  ;;  %v660_v37 = vmul.f32 0.01, %v630_v57  ;;  %vm652_vm2 = vcmp.ge.f32.partialorder %v630_v57, 0.0 }
 0x1d7   :  { %v635_v30 = vpop.f32.mrf.mxu0 }
 0x1d8   :  { %v636_v53 = vadd.f32 %v635_v30, %v1074_v34  ;;  %v661_v61 = vmul.f32 0.01, %v632_v52  ;;  %vm653_vm0 = vcmp.ge.f32.partialorder %v632_v52, 0.0  ;;  %v668_v24 = vsel %vm652_vm2, %v630_v57, %v660_v37 }
 0x1d9   :  { %v848_v32 = vpop.eup %847  ;;  %v637_v33 = vpop.f32.mrf.mxu0 }
 0x1da   :  { %v406_v36 = vadd.f32 1.0, %v848_v32  ;;  %v638_v49 = vadd.f32 %v637_v33, %v1074_v34  ;;  %v662_v62 = vmul.f32 0.01, %v636_v53  ;;  %vm654_vm15 = vcmp.ge.f32.partialorder %v636_v53, 0.0 }
 0x1db   :  { %v850_v38 = vpop.eup %849  ;;  %v641_v39 = vpop.f32.mrf.mxu0  ;;  %v669_v7 = vsel %vm653_vm0, %v632_v52, %v661_v61 }
 0x1dc   :  { %851 = vrcp.f32 %v406_v36  ;;  %v407_v40 = vadd.f32 1.0, %v850_v38  ;;  %v642_v47 = vadd.f32 %v641_v39, %v1076_v35  ;;  %vm655_vm14 = vcmp.ge.f32.partialorder %v638_v49, 0.0 }
 0x1dd   :  { %v643_v41 = vpop.f32.mrf.mxu0  ;;  %v670_v6 = vsel %vm654_vm15, %v636_v53, %v662_v62 }
 0x1de   :  { %853 = vrcp.f32 %v407_v40  ;;  %v644_v44 = vadd.f32 %v643_v41, %v1076_v35  ;;  %v664_v58 = vmul.f32 0.01, %v642_v47  ;;  %v663_v35 = vmul.f32 0.01, %v638_v49 }
 0x1df   :  { %v647_v43 = vpop.f32.mrf.mxu0  ;;  %vm656_vm13 = vcmp.ge.f32.partialorder %v642_v47, 0.0 }
 0x1e0   :  { %v648_v45 = vadd.f32 %v647_v43, %v1072_v31  ;;  %v665_v55 = vmul.f32 0.01, %v644_v44  ;;  %vm657_vm12 = vcmp.ge.f32.partialorder %v644_v44, 0.0  ;;  %v672_v2 = vsel %vm656_vm13, %v642_v47, %v664_v58 }
 0x1e1   :  { %v649_v48 = vpop.f32.mrf.mxu0  ;;  %v671_v4 = vsel %vm655_vm14, %v638_v49, %v663_v35 }
 0x1e2   :  { %v650_v50 = vadd.f32 %v649_v48, %v1072_v31  ;;  %v666_v54 = vmul.f32 0.01, %v648_v45  ;;  %vm658_vm10 = vcmp.ge.f32.partialorder %v648_v45, 0.0  ;;  %v1162_v31 = vpop.permute.xlu1 %433  ;;  %v673_v63 = vsel %vm657_vm12, %v644_v44, %v665_v55 }
 0x1e4   :  { %v667_v56 = vmul.f32 0.01, %v650_v50  ;;  %vm659_vm11 = vcmp.ge.f32.partialorder %v650_v50, 0.0  ;;  %v674_v34 = vsel %vm658_vm10, %v648_v45, %v666_v54 }
 0x1e6   :  { %v675_v60 = vsel %vm659_vm11, %v650_v50, %v667_v56  ;;  %v1172_v23 = vpop.permute.xlu1 %441 }
 0x1e7   :  { %700 = vmatprep.subr.mxu1 %v675_v60 }
 0x1e8   :  { %701 = vmatpush1.msra.mxu1 %v674_v34 }
 0x1e9   :  { %v852_v1 = vpop.eup %851  ;;  %702 = vmatprep.subr.mxu1 %v673_v63 }
 0x1ea   :  { %v415_v3 = vrot.slane %v852_v1, %v1160_v59  ;;  %703 = vmatpush1.msra.mxu1 %v672_v2 }
 0x1eb   :  { %v854_v5 = vpop.eup %853  ;;  %704 = vmatprep.subr.mxu1 %v671_v4 }
 0x1ec   :  { %v419_v10 = vrot.slane %v854_v5, %v1160_v59  ;;  %v420_v11 = vmul.f32 %v415_v3, %v1130_v15  ;;  %v422_v12 = vmul.f32 %v415_v3, %v1134_v9  ;;  %705 = vmatpush1.msra.mxu1 %v670_v6  ;;  %v424_v14 = vmul.f32 %v415_v3, %v1138_v18 }
 0x1ed   :  { %v426_v22 = vmul.f32 %v415_v3, %v1142_v20  ;;  %706 = vmatprep.subr.mxu1 %v669_v7 }
 0x1ee   :  { %v421_v25 = vmul.f32 %v419_v10, %v1132_v16  ;;  %v444_v26 = vadd.f32 %v1152_v46, %v420_v11  ;;  %v423_v15 = vmul.f32 %v419_v10, %v1136_v17  ;;  %v446_v9 = vadd.f32 %v1162_v31, %v422_v12  ;;  %707 = vmatpush1.msra.mxu1 %v668_v24 }
 0x1ef   :  { %v425_v27 = vmul.f32 %v419_v10, %v1140_v19  ;;  %v448_v18 = vadd.f32 %v1169_v13, %v424_v14  ;;  %v427_v28 = vmul.f32 %v419_v10, %v1144_v21  ;;  %v450_v20 = vadd.f32 %v1172_v23, %v426_v22  ;;  %829 = vmatmul.mubr.msk.f32.vlgmr.msra.gmra.mxu1 %vm82_vm1, %v1106_v8  ;;  %v540_v21 = vpop.f32.mrf.mxu1 }
 0x1f0   :  { %v445_v16 = vadd.f32 %v1152_v46, %v421_v25  ;;  %452 = vst [vmem:[#allocation7] sm:$0xff] %v444_v26  ;;  %v447_v29 = vadd.f32 %v1162_v31, %v423_v15  ;;  %454 = vst [vmem:[#allocation7 + $0x10] sm:$0xff] %v446_v9 }
 0x1f1   :  { %v449_v17 = vadd.f32 %v1169_v13, %v425_v27  ;;  %456 = vst [vmem:[#allocation7 + $0x20] sm:$0xff] %v448_v18  ;;  %v451_v19 = vadd.f32 %v1172_v23, %v427_v28  ;;  %458 = vst [vmem:[#allocation7 + $0x30] sm:$0xff] %v450_v20  ;;  %v542_v30 = vpop.f32.mrf.mxu1 }
 0x1f2   :  { %453 = vst [vmem:[#allocation7 + $0x8] sm:$0xff] %v445_v16  ;;  %455 = vst [vmem:[#allocation7 + $0x18] sm:$0xff] %v447_v29 }
 0x1f3   :  { %457 = vst [vmem:[#allocation7 + $0x28] sm:$0xff] %v449_v17  ;;  %459 = vst [vmem:[#allocation7 + $0x38] sm:$0xff] %v451_v19  ;;  %v546_v32 = vpop.f32.mrf.mxu1 }
 0x1f5   :  { %v548_v8 = vpop.f32.mrf.mxu1 }
 0x1f7   :  { %v552_v33 = vpop.f32.mrf.mxu1 }
 0x1f9   :  { %v554_v36 = vpop.f32.mrf.mxu1 }
 0x1fb   :  { %v558_v38 = vpop.f32.mrf.mxu1 }
 0x1fd   :  { %v560_v39 = vpop.f32.mrf.mxu1 }
 0x2af   :  { %v742_v40 = vpop.f32.mrf.mxu1 }
 0x2b0   :  { %v743_v41 = vadd.f32 %v742_v40, %v1146_v0 }
 0x2b1   :  { %v744_v42 = vpop.f32.mrf.mxu1 }
 0x2b2   :  { %v830_v43 = vmul.f32 -1.442695, %v743_v41  ;;  %v745_v44 = vadd.f32 %v744_v42, %v1146_v0 }
 0x2b4   :  { %855 = vpow2.f32 %v830_v43  ;;  %v831_v45 = vmul.f32 -1.442695, %v745_v44 }
 0x2b6   :  { %857 = vpow2.f32 %v831_v45 }
 0x2c1   :  { %v856_v47 = vpop.eup %855 }
 0x2c2   :  { %v753_v48 = vadd.f32 1.0, %v856_v47 }
 0x2c3   :  { %v858_v49 = vpop.eup %857 }
 0x2c4   :  { %859 = vrcp.f32 %v753_v48  ;;  %v754_v50 = vadd.f32 1.0, %v858_v49 }
 0x2c6   :  { %861 = vrcp.f32 %v754_v50 }
 0x2d1   :  { %v860_v51 = vpop.eup %859 }
 0x2d2   :  { %v762_v52 = vrot.slane %v860_v51, %v1160_v59 }
 0x2d3   :  { %v862_v53 = vpop.eup %861 }
 0x2d4   :  { %v767_v54 = vmul.f32 %v762_v52, %v540_v21  ;;  %v769_v55 = vmul.f32 %v762_v52, %v546_v32  ;;  %v771_v56 = vmul.f32 %v762_v52, %v552_v33  ;;  %v773_v57 = vmul.f32 %v762_v52, %v558_v38 }
 0x2d5   :  { %v766_v58 = vrot.slane %v862_v53, %v1160_v59 }
 0x2d6   :  { %v775_v0 = vadd.f32 %v767_v54, %v1152_v46  ;;  %v777_v35 = vadd.f32 %v769_v55, %v1162_v31  ;;  %v779_v60 = vadd.f32 %v771_v56, %v1169_v13  ;;  %v781_v61 = vadd.f32 %v773_v57, %v1172_v23 }
 0x2d7   :  { %v768_v62 = vmul.f32 %v766_v58, %v542_v30  ;;  %v770_v34 = vmul.f32 %v766_v58, %v548_v8  ;;  %v772_v63 = vmul.f32 %v766_v58, %v554_v36  ;;  %v774_v1 = vmul.f32 %v766_v58, %v560_v39 }
 0x2d8   :  { %784 = vst [vmem:[#allocation7 + $0x40] sm:$0xff] %v775_v0  ;;  %786 = vst [vmem:[#allocation7 + $0x50] sm:$0xff] %v777_v35 }
 0x2d9   :  { %788 = vst [vmem:[#allocation7 + $0x60] sm:$0xff] %v779_v60  ;;  %790 = vst [vmem:[#allocation7 + $0x70] sm:$0xff] %v781_v61  ;;  %v776_v59 = vadd.f32 %v768_v62, %v1152_v46  ;;  %v778_v37 = vadd.f32 %v770_v34, %v1162_v31  ;;  %v780_v2 = vadd.f32 %v772_v63, %v1169_v13 }
 0x2da   :  { %v782_v3 = vadd.f32 %v774_v1, %v1172_v23 }
 0x2db   :  { %785 = vst [vmem:[#allocation7 + $0x48] sm:$0xff] %v776_v59  ;;  %787 = vst [vmem:[#allocation7 + $0x58] sm:$0xff] %v778_v37 }
 0x2dc   :  { %789 = vst [vmem:[#allocation7 + $0x68] sm:$0xff] %v780_v2  ;;  %791 = vst [vmem:[#allocation7 + $0x78] sm:$0xff] %v782_v3 }
 0x2dd   :  { %914 = shalt.err (!%p911_p0)
}
 0x2de   :  { %803 = dma.vmem_to_hbm [thread:$0]  %s798_s20, 2048, %s1213_s5, [#allocation4], %s930_s21, %s930_s21, %s931_s22  }
 0x2df   :  { %927 = dma.done.wait [#allocation4], 2048  }
 0x2e0   :  { %928 = vsyncadd [#allocation4], 4294965248 }
 0x2e1   :  { %807 = vsyncpa [#allocation3], 1 }
 0x2e2   :  { %808 = vsyncpa [#allocation6], 1 }
 0x2e3   :  { %809 = vsyncpa [#allocation4], 1 }

</bundles_post_ra>
